<compile_context>
chip_gen: v5e
topology: v5e:2x2
jax: 0.10.0
libtpu: 0.0.40
codegen_flags: <defaults>
</compile_context>

<pallas_src>
import functools

import jax
import jax.numpy as jnp
from jax.experimental import pallas as pl
from jax.experimental.pallas import tpu as pltpu

BN_EPS = 1e-5


def _tap_stack(y, seg_len):
    """(C, N) -> (3C, N) with N = nseg*seg_len.

    Rows are [y[l-1], y[l], y[l+1]] per length-seg_len segment, with zeros at each
    segment boundary (so concatenated batch samples never bleed into each other).
    """
    C, N = y.shape
    nseg = N // seg_len
    base = jax.lax.broadcasted_iota(jnp.int32, (C, seg_len), 1)
    pos = jnp.concatenate([base] * nseg, axis=1) if nseg > 1 else base
    y_prev = jnp.where(pos == 0, 0.0, pltpu.roll(y, 1, 1))            # y_prev[:, l] = y[:, l-1]
    y_next = jnp.where(pos == seg_len - 1, 0.0, pltpu.roll(y, N - 1, 1))  # y[:, l+1]
    return jnp.concatenate([y_prev, y, y_next], axis=0)


# ---------------------------------------------------------------------------
# Kernel 1: h = conv1(relu(bn1(x))) over Bt batch samples folded into lanes.
# Emits h in bf16 plus a packed (width, 2) [sum, sumsq] partial for BN2 stats,
# computed from the f32 accumulator before the bf16 cast.
# ---------------------------------------------------------------------------
def bn_relu_conv1_kernel(x_ref, s1_ref, t1_ref, w1_ref, h_ref, st2_ref):
    Bt, C, L = x_ref.shape
    y = jnp.concatenate([x_ref[b] for b in range(Bt)], axis=1)        # (C, Bt*L) f32
    y = jnp.maximum(y * s1_ref[...] + t1_ref[...], 0.0)               # bn1 + relu (f32 VPU)
    y3 = _tap_stack(y, L).astype(jnp.bfloat16)                        # (3C, Bt*L) bf16
    h = jnp.dot(w1_ref[...], y3, preferred_element_type=jnp.float32)  # (width, Bt*L) f32
    st2_ref[0] = jnp.concatenate(
        [jnp.sum(h, axis=1, keepdims=True),
         jnp.sum(h * h, axis=1, keepdims=True)], axis=1)              # (width, 2)
    for b in range(Bt):
        h_ref[b] = h[:, b * L:(b + 1) * L].astype(jnp.bfloat16)


# ---------------------------------------------------------------------------
# Kernel 2: out = conv2(relu(bn2(h))) + skip.  BN2 finishing math (mean/var ->
# scale/shift) is done in-kernel from the summed raw statistics.
# ---------------------------------------------------------------------------
def bn_relu_conv2_res_kernel(h_ref, skip_ref, st2_ref, g2_ref, b2_ref, w2_ref,
                             o_ref, *, inv_n):
    Bt, W, L = h_ref.shape
    mean2 = st2_ref[:, 0:1] * inv_n                                   # (W, 1)
    var2 = jnp.maximum(st2_ref[:, 1:2] * inv_n - mean2 * mean2, 0.0)
    s2 = g2_ref[...] * jax.lax.rsqrt(var2 + BN_EPS)
    t2 = b2_ref[...] - mean2 * s2
    y = jnp.concatenate([h_ref[b].astype(jnp.float32) for b in range(Bt)], axis=1)
    y = jnp.maximum(y * s2 + t2, 0.0)                                 # bn2 + relu (f32)
    y3 = _tap_stack(y, L).astype(jnp.bfloat16)                        # (3W, Bt*L) bf16
    o = jnp.dot(w2_ref[...], y3, preferred_element_type=jnp.float32)  # (Cout, Bt*L) f32
    for b in range(Bt):
        o_ref[b] = o[:, b * L:(b + 1) * L] + skip_ref[b]


# ---------------------------------------------------------------------------
# Parameter init (deterministic, PyTorch-like scales).
# ---------------------------------------------------------------------------
def init_params(key, in_channels, channels):
    width = channels                     # groups=1, width_per_group=64 -> width = channels
    ks = jax.random.split(key, 6)
    return {
        "g1": 1.0 + 0.1 * jax.random.normal(ks[0], (in_channels, 1), jnp.float32),
        "b1": 0.1 * jax.random.normal(ks[1], (in_channels, 1), jnp.float32),
        "w1": jax.random.normal(ks[2], (width, in_channels, 3), jnp.float32)
              / jnp.sqrt(3.0 * in_channels),
        "g2": 1.0 + 0.1 * jax.random.normal(ks[3], (width, 1), jnp.float32),
        "b2": 0.1 * jax.random.normal(ks[4], (width, 1), jnp.float32),
        "w2": jax.random.normal(ks[5], (channels, width, 3), jnp.float32)
              / jnp.sqrt(3.0 * width),
    }


def _pick_bt(batch, length, target_lanes=2048):
    """Samples per grid step so the matmul RHS is ~target_lanes lanes wide."""
    bt = max(1, min(batch, target_lanes // length))
    while batch % bt:
        bt -= 1
    return bt


# ---------------------------------------------------------------------------
# Wrapper: BN1 stats via jnp, then two pallas_calls.
# ---------------------------------------------------------------------------
def basic_block(x, params):
    B, C, L = x.shape
    width = params["w1"].shape[0]
    Cout = params["w2"].shape[0]
    assert Cout == C, "identity-shortcut configuration requires in_channels == channels"
    assert L % 128 == 0, "L must be a multiple of 128 for lane-dense tiles"
    n = float(B * L)

    bt = _pick_bt(B, L)
    g = B // bt
    cparams = pltpu.CompilerParams(
        dimension_semantics=("parallel",),
        vmem_limit_bytes=32 * 1024 * 1024,
    )

    # ---- BN1 batch statistics + per-channel affine: plain jnp (mem-bound) ----
    mean1 = jnp.mean(x, axis=(0, 2))                                   # (C,)
    var1 = jnp.mean((x - mean1[None, :, None]) ** 2, axis=(0, 2))      # (C,)
    s1 = (params["g1"][:, 0] * jax.lax.rsqrt(var1 + BN_EPS))[:, None]  # (C, 1)
    t1 = params["b1"] - mean1[:, None] * s1                            # (C, 1)

    # Flattened conv weights, taps ordered [l-1, l, l+1], bf16 MXU operands.
    w1f = params["w1"].transpose(0, 2, 1).reshape(width, 3 * C).astype(jnp.bfloat16)
    w2f = params["w2"].transpose(0, 2, 1).reshape(Cout, 3 * width).astype(jnp.bfloat16)

    # ---- bn1 -> relu -> conv1 (one MXU matmul per step), h in bf16 + BN2 partials ----
    h, st2 = pl.pallas_call(
        bn_relu_conv1_kernel,
        out_shape=(jax.ShapeDtypeStruct((B, width, L), jnp.bfloat16),
                   jax.ShapeDtypeStruct((g, width, 2), jnp.float32)),
        grid=(g,),
        in_specs=[pl.BlockSpec((bt, C, L), lambda i: (i, 0, 0)),
                  pl.BlockSpec((C, 1), lambda i: (0, 0)),
                  pl.BlockSpec((C, 1), lambda i: (0, 0)),
                  pl.BlockSpec((width, 3 * C), lambda i: (0, 0))],
        out_specs=(pl.BlockSpec((bt, width, L), lambda i: (i, 0, 0)),
                   pl.BlockSpec((1, width, 2), lambda i: (i, 0, 0))),
        compiler_params=cparams,
    )(x, s1, t1, w1f)
    st2_tot = st2.sum(axis=0)                                          # (width, 2)

    # ---- bn2 -> relu -> conv2 (one MXU matmul per step) -> + skip ----
    y = pl.pallas_call(
        functools.partial(bn_relu_conv2_res_kernel, inv_n=1.0 / n),
        out_shape=jax.ShapeDtypeStruct((B, Cout, L), jnp.float32),
        grid=(g,),
        in_specs=[pl.BlockSpec((bt, width, L), lambda i: (i, 0, 0)),
                  pl.BlockSpec((bt, C, L), lambda i: (i, 0, 0)),
                  pl.BlockSpec((width, 2), lambda i: (0, 0)),
                  pl.BlockSpec((width, 1), lambda i: (0, 0)),
                  pl.BlockSpec((width, 1), lambda i: (0, 0)),
                  pl.BlockSpec((Cout, 3 * width), lambda i: (0, 0))],
        out_specs=pl.BlockSpec((bt, Cout, L), lambda i: (i, 0, 0)),
        compiler_params=cparams,
    )(h, x, st2_tot, params["g2"], params["b2"], w2f)
    return y


# ---------------------------------------------------------------------------
# Pure-JAX f32 reference (mirrors the PyTorch forward) for a sanity check.
# ---------------------------------------------------------------------------
def reference(x, params):
    B, C, L = x.shape

    def conv1d(z, w):
        return jax.lax.conv_general_dilated(
            z, w, window_strides=(1,), padding=((1, 1),),
            dimension_numbers=("NCH", "OIH", "NCH"))

    skip = x
    m1 = x.mean(axis=(0, 2), keepdims=True)
    v1 = ((x - m1) ** 2).mean(axis=(0, 2), keepdims=True)
    xn = (x - m1) / jnp.sqrt(v1 + BN_EPS) * params["g1"].reshape(1, C, 1) \
         + params["b1"].reshape(1, C, 1)
    xr = jnp.maximum(xn, 0.0)
    h = conv1d(xr, params["w1"])
    width = h.shape[1]
    m2 = h.mean(axis=(0, 2), keepdims=True)
    v2 = ((h - m2) ** 2).mean(axis=(0, 2), keepdims=True)
    hn = (h - m2) / jnp.sqrt(v2 + BN_EPS) * params["g2"].reshape(1, width, 1) \
         + params["b2"].reshape(1, width, 1)
    hr = jnp.maximum(hn, 0.0)
    y = conv1d(hr, params["w2"])
    return y + skip


if __name__ == "__main__":
    key = jax.random.PRNGKey(0)
    kx, kp = jax.random.split(key)
    # identity-shortcut config: stride=1, in_channels == channels (expansion=1)
    B, C, L = 2, 32, 256
    x = jax.random.normal(kx, (B, C, L), jnp.float32)
    params = init_params(kp, C, C)

    y = jax.block_until_ready(basic_block(x, params))
    y_ref = reference(x, params)

    assert y.shape == (B, C, L)
    # bf16 MXU operands + bf16 h intermediate vs. the pure-f32 reference: outputs are
    # O(1); the bf16 rounding through two k=3 convs gives ~1e-2 max abs deviation,
    # so use a 5e-2 bound (still catches any structural/tap-ordering bug by orders
    # of magnitude).
    err = float(jnp.max(jnp.abs(y - y_ref)))
    assert err < 5e-2, f"max abs err {err}"
    print("KERNEL_OK")
</pallas_src>

<mosaic_0001>
module attributes {stable_mosaic.version = 11 : i64} {
  func.func @bn_relu_conv1_kernel(%arg0: i32, %arg1: memref<2x32x256xf32, #tpu.memory_space<vmem>>, %arg2: memref<32x1xf32, #tpu.memory_space<vmem>>, %arg3: memref<32x1xf32, #tpu.memory_space<vmem>>, %arg4: memref<32x96xbf16, #tpu.memory_space<vmem>>, %arg5: memref<2x32x256xbf16, #tpu.memory_space<vmem>>, %arg6: memref<1x32x2xf32, #tpu.memory_space<vmem>>) attributes {dimension_semantics = [#tpu.dimension_semantics<parallel>], iteration_bounds = array<i64: 1>, scalar_prefetch = 0 : i64, scratch_operands = 0 : i64, tpu.core_type = #tpu.core_type<tc>, window_params = [{transform_indices = @transform_0, window_bounds = array<i64: 2, 32, 256>}, {pipeline_mode = #tpu.pipeline_mode<synchronous>, transform_indices = @transform_1, window_bounds = array<i64: 32, 1>}, {pipeline_mode = #tpu.pipeline_mode<synchronous>, transform_indices = @transform_2, window_bounds = array<i64: 32, 1>}, {pipeline_mode = #tpu.pipeline_mode<synchronous>, transform_indices = @transform_3, window_bounds = array<i64: 32, 96>}, {transform_indices = @transform_4, window_bounds = array<i64: 2, 32, 256>}, {transform_indices = @transform_5, window_bounds = array<i64: 1, 32, 2>}]} {
    %c0 = arith.constant 0 : index
    %c0_0 = arith.constant 0 : index
    %c0_1 = arith.constant 0 : index
    %0 = vector.load %arg1[%c0, %c0_0, %c0_1] : memref<2x32x256xf32, #tpu.memory_space<vmem>>, vector<1x32x256xf32>
    %1 = vector.shape_cast %0 : vector<1x32x256xf32> to vector<32x256xf32>
    %c1 = arith.constant 1 : index
    %c0_2 = arith.constant 0 : index
    %c0_3 = arith.constant 0 : index
    %2 = vector.load %arg1[%c1, %c0_2, %c0_3] : memref<2x32x256xf32, #tpu.memory_space<vmem>>, vector<1x32x256xf32>
    %3 = vector.shape_cast %2 : vector<1x32x256xf32> to vector<32x256xf32>
    %4 = tpu.concatenate %1, %3 in 1 : vector<32x256xf32>, vector<32x256xf32> -> vector<32x512xf32>
    %c0_4 = arith.constant 0 : index
    %c0_5 = arith.constant 0 : index
    %5 = vector.load %arg2[%c0_4, %c0_5] : memref<32x1xf32, #tpu.memory_space<vmem>>, vector<32x1xf32>
    %6 = vector.broadcast %5 : vector<32x1xf32> to vector<32x512xf32>
    %7 = arith.mulf %4, %6 : vector<32x512xf32>
    %c0_6 = arith.constant 0 : index
    %c0_7 = arith.constant 0 : index
    %8 = vector.load %arg3[%c0_6, %c0_7] : memref<32x1xf32, #tpu.memory_space<vmem>>, vector<32x1xf32>
    %9 = vector.broadcast %8 : vector<32x1xf32> to vector<32x512xf32>
    %10 = arith.addf %7, %9 : vector<32x512xf32>
    %cst = arith.constant 0.000000e+00 : f32
    %11 = vector.broadcast %cst : f32 to vector<32x512xf32>
    %12 = arith.maximumf %10, %11 : vector<32x512xf32>
    %13 = tpu.iota {dimensions = array<i32: 1>} : vector<32x256xi32>
    %14 = tpu.concatenate %13, %13 in 1 : vector<32x256xi32>, vector<32x256xi32> -> vector<32x512xi32>
    %c0_i32 = arith.constant 0 : i32
    %15 = vector.broadcast %c0_i32 : i32 to vector<32x512xi32>
    %16 = arith.cmpi eq, %14, %15 : vector<32x512xi32>
    %c1_i32 = arith.constant 1 : i32
    %17 = tpu.dynamic_rotate %12 by %c1_i32 dim 1 : vector<32x512xf32>, i32 -> vector<32x512xf32>
    %cst_8 = arith.constant 0.000000e+00 : f32
    %18 = vector.broadcast %cst_8 : f32 to vector<32x512xf32>
    %19 = arith.select %16, %18, %17 : vector<32x512xi1>, vector<32x512xf32>
    %c255_i32 = arith.constant 255 : i32
    %20 = vector.broadcast %c255_i32 : i32 to vector<32x512xi32>
    %21 = arith.cmpi eq, %14, %20 : vector<32x512xi32>
    %c511_i32 = arith.constant 511 : i32
    %22 = tpu.dynamic_rotate %12 by %c511_i32 dim 1 : vector<32x512xf32>, i32 -> vector<32x512xf32>
    %cst_9 = arith.constant 0.000000e+00 : f32
    %23 = vector.broadcast %cst_9 : f32 to vector<32x512xf32>
    %24 = arith.select %21, %23, %22 : vector<32x512xi1>, vector<32x512xf32>
    %25 = tpu.concatenate %19, %12, %24 in 0 : vector<32x512xf32>, vector<32x512xf32>, vector<32x512xf32> -> vector<96x512xf32>
    %26 = arith.truncf %25 : vector<96x512xf32> to vector<96x512xbf16>
    %c0_10 = arith.constant 0 : index
    %c0_11 = arith.constant 0 : index
    %27 = vector.load %arg4[%c0_10, %c0_11] : memref<32x96xbf16, #tpu.memory_space<vmem>>, vector<32x96xbf16>
    %cst_12 = arith.constant dense<0.000000e+00> : vector<32x512xf32>
    %28 = tpu.matmul %27, %26, %cst_12 {dimension_numbers = #tpu.dot_dimension_numbers<[1], [0], [0], [1], [0, 0, 1, 1], [], []>} : vector<32x96xbf16>, vector<96x512xbf16>, vector<32x512xf32> -> vector<32x512xf32>
    %cst_13 = arith.constant dense<0.000000e+00> : vector<32xf32>
    %29 = vector.multi_reduction <add>, %28, %cst_13 [1] : vector<32x512xf32> to vector<32xf32>
    %30 = vector.shape_cast %29 : vector<32xf32> to vector<32x1xf32>
    %31 = arith.mulf %28, %28 : vector<32x512xf32>
    %cst_14 = arith.constant dense<0.000000e+00> : vector<32xf32>
    %32 = vector.multi_reduction <add>, %31, %cst_14 [1] : vector<32x512xf32> to vector<32xf32>
    %33 = vector.shape_cast %32 : vector<32xf32> to vector<32x1xf32>
    %34 = tpu.concatenate %30, %33 in 1 : vector<32x1xf32>, vector<32x1xf32> -> vector<32x2xf32>
    %c0_15 = arith.constant 0 : index
    %c0_16 = arith.constant 0 : index
    %c0_17 = arith.constant 0 : index
    %35 = vector.load %arg6[%c0_15, %c0_16, %c0_17] : memref<1x32x2xf32, #tpu.memory_space<vmem>>, vector<1x32x2xf32>
    %36 = vector.shape_cast %35 : vector<1x32x2xf32> to vector<32x2xf32>
    %37 = vector.shape_cast %34 : vector<32x2xf32> to vector<1x32x2xf32>
    tpu.vector_store %arg6[%c0_15, %c0_16, %c0_17], %37 {strides = array<i32>} : memref<1x32x2xf32, #tpu.memory_space<vmem>>, vector<1x32x2xf32>,
    %38 = vector.extract_strided_slice %28 {offsets = [0, 0], sizes = [32, 256], strides = [1, 1]} : vector<32x512xf32> to vector<32x256xf32>
    %39 = arith.truncf %38 : vector<32x256xf32> to vector<32x256xbf16>
    %c0_18 = arith.constant 0 : index
    %c0_19 = arith.constant 0 : index
    %c0_20 = arith.constant 0 : index
    %40 = vector.load %arg5[%c0_18, %c0_19, %c0_20] : memref<2x32x256xbf16, #tpu.memory_space<vmem>>, vector<1x32x256xbf16>
    %41 = vector.shape_cast %40 : vector<1x32x256xbf16> to vector<32x256xbf16>
    %42 = vector.shape_cast %39 : vector<32x256xbf16> to vector<1x32x256xbf16>
    tpu.vector_store %arg5[%c0_18, %c0_19, %c0_20], %42 {strides = array<i32>} : memref<2x32x256xbf16, #tpu.memory_space<vmem>>, vector<1x32x256xbf16>,
    %43 = vector.extract_strided_slice %28 {offsets = [0, 256], sizes = [32, 256], strides = [1, 1]} : vector<32x512xf32> to vector<32x256xf32>
    %44 = arith.truncf %43 : vector<32x256xf32> to vector<32x256xbf16>
    %c1_21 = arith.constant 1 : index
    %c0_22 = arith.constant 0 : index
    %c0_23 = arith.constant 0 : index
    %45 = vector.load %arg5[%c1_21, %c0_22, %c0_23] : memref<2x32x256xbf16, #tpu.memory_space<vmem>>, vector<1x32x256xbf16>
    %46 = vector.shape_cast %45 : vector<1x32x256xbf16> to vector<32x256xbf16>
    %47 = vector.shape_cast %44 : vector<32x256xbf16> to vector<1x32x256xbf16>
    tpu.vector_store %arg5[%c1_21, %c0_22, %c0_23], %47 {strides = array<i32>} : memref<2x32x256xbf16, #tpu.memory_space<vmem>>, vector<1x32x256xbf16>,
    return
  }
  func.func @transform_0(%arg0: i32) -> (i32, i32, i32) {
    %c0_i32 = arith.constant 0 : i32
    %c0_i32_0 = arith.constant 0 : i32
    %c0_i32_1 = arith.constant 0 : i32
    return %arg0, %c0_i32, %c0_i32_0 : i32, i32, i32
  }
  func.func @transform_1(%arg0: i32) -> (i32, i32) {
    %c0_i32 = arith.constant 0 : i32
    %c0_i32_0 = arith.constant 0 : i32
    %c0_i32_1 = arith.constant 0 : i32
    return %c0_i32, %c0_i32_0 : i32, i32
  }
  func.func @transform_2(%arg0: i32) -> (i32, i32) {
    %c0_i32 = arith.constant 0 : i32
    %c0_i32_0 = arith.constant 0 : i32
    %c0_i32_1 = arith.constant 0 : i32
    return %c0_i32, %c0_i32_0 : i32, i32
  }
  func.func @transform_3(%arg0: i32) -> (i32, i32) {
    %c0_i32 = arith.constant 0 : i32
    %c0_i32_0 = arith.constant 0 : i32
    %c0_i32_1 = arith.constant 0 : i32
    return %c0_i32, %c0_i32_0 : i32, i32
  }
  func.func @transform_4(%arg0: i32) -> (i32, i32, i32) {
    %c0_i32 = arith.constant 0 : i32
    %c0_i32_0 = arith.constant 0 : i32
    %c0_i32_1 = arith.constant 0 : i32
    return %arg0, %c0_i32, %c0_i32_0 : i32, i32, i32
  }
  func.func @transform_5(%arg0: i32) -> (i32, i32, i32) {
    %c0_i32 = arith.constant 0 : i32
    %c0_i32_0 = arith.constant 0 : i32
    %c0_i32_1 = arith.constant 0 : i32
    return %arg0, %c0_i32, %c0_i32_0 : i32, i32, i32
  }
}

</mosaic_0001>

<bundles_post_ra>
// kernel: tpu_custom_call.1
= control target key start
LH: loop header
LB: loop body
LE: loop exit
PB: predicated region body
PF: predicated region fallthrough
CT: control target
= control target key end

     0   :  { %11 = vsyncpa [#allocation3], 0  ;;  %s948_s0 = inlined_call_operand.hbm [shape: f32[2,32,256], index: 0, kind: input, shape index: {}]   ;;  %s949_s1 = inlined_call_operand.vmem [shape: f32[32,1], index: 1, kind: input, shape index: {}]   ;;  %s950_s2 = inlined_call_operand.vmem [shape: f32[32,1], index: 2, kind: input, shape index: {}]   ;;  %s951_s3 = inlined_call_operand.vmem [shape: bf16[32,96], index: 3, kind: input, shape index: {}]   ;;  %s952_s4 = inlined_call_operand.hbm [shape: bf16[2,32,256], index: 4, kind: output, shape index: {0}]   ;;  %s953_s5 = inlined_call_operand.vmem [shape: f32[1,32,2], index: 5, kind: output, shape index: {1}]  }
   0x1   :  { %12 = vsyncpa [#allocation4], 0  ;;  %s17_s20 = sshll.u32 %s948_s0, 4  ;;  %s718_s21 = smov [#allocation2]   ;;  %s18_s20 = int_to_ptr.hbm [resolvable:$true] %s17_s20 }
   0x2   :  { %s19_s22 = sshll.u32 %s718_s21, 4  ;;  %s719_s23 = smov 256   ;;  %s20_s22 = int_to_ptr.vmem [resolvable:$true] %s19_s22 }
   0x3   :  { %s720_s24 = smov 16  }
   0x4   :  { %25 = dma.hbm_to_vmem [thread:$0]  %s18_s20, 2048, %s20_s22, [#allocation3], %s719_s23, %s719_s23, %s720_s24  }
   0x5   :  { %714 = dma.done.wait [#allocation3], 2048  }
   0x6   :  { %715 = vsyncadd [#allocation3], 4294965248  ;;  %v721_v0 = vmov 0   ;;  %v96_v1 = vld [vmem:[%s950_s2 + $0x10] sm:$0xff]  ;;  %v54_v3 = vld [vmem:[%s949_s1] sm:$0xff]  ;;  %vm325_vm6 = vcmask 785408  }
   0x7   :  { %584 = vset.pattern.permute.xlu1 %v721_v0  ;;  %583 = vset.pattern.permute.xlu0 %v721_v0  ;;  %v56_v2 = vld [vmem:[%s949_s1 + $0x10] sm:$0xff]  ;;  %v97_v4 = vld [vmem:[%s950_s2 + $0x18] sm:$0xff]  ;;  %v55_v6 = vld [vmem:[%s949_s1 + $0x8] sm:$0xff]  ;;  %s497_s20 = sshll.u32 %s952_s4, 4  ;;  %s724_s21 = smov [#allocation5]   ;;  %vm464_vm7 = vcmask 7168   ;;  %s498_s20 = int_to_ptr.hbm [resolvable:$true] %s497_s20 }
   0x8   :  { %585 = vset.pattern.permute.xlu2 %v721_v0  ;;  %110 = vperm.xlu1 %584, %v96_v1   ;;  %v57_v5 = vld [vmem:[%s949_s1 + $0x18] sm:$0xff]  ;;  %v95_v7 = vld [vmem:[%s950_s2 + $0x8] sm:$0xff]  ;;  %v94_v8 = vld [vmem:[%s950_s2] sm:$0xff]  ;;  %s722_s1 = smov 127   ;;  %s723_s2 = smov 1   ;;  %vm469_vm8 = vcmask 15360  }
   0x9   :  { %70 = vperm.xlu0 %583, %v56_v2   ;;  %60 = vperm.xlu2 %585, %v54_v3   ;;  %v41_v11 = vld [vmem:[#allocation2 + $0x20] sm:$0xff]  ;;  %v51_v13 = vld [vmem:[#allocation2 + $0x68] sm:$0xff]  ;;  %v43_v19 = vld [vmem:[#allocation2 + $0x30] sm:$0xff]  ;;  %s495_s22 = sshll.u32 %s724_s21, 4  ;;  %s725_s23 = smov 128   ;;  %s496_s22 = int_to_ptr.vmem [resolvable:$true] %s495_s22 }
   0xa   :  { %v50_v12 = vld [vmem:[#allocation2 + $0x60] sm:$0xff]  ;;  %v42_v18 = vld [vmem:[#allocation2 + $0x28] sm:$0xff]  ;;  %v44_v20 = vld [vmem:[#allocation2 + $0x38] sm:$0xff]  ;;  %s726_s24 = smov 8  }
   0xb   :  { %v52_v21 = vld [vmem:[#allocation2 + $0x70] sm:$0xff]  ;;  %v53_v22 = vld [vmem:[#allocation2 + $0x78] sm:$0xff]  ;;  %v37_v27 = vld [vmem:[#allocation2] sm:$0xff] }
   0xc   :  { %v38_v34 = vld [vmem:[#allocation2 + $0x8] sm:$0xff]  ;;  %v39_v40 = vld [vmem:[#allocation2 + $0x10] sm:$0xff]  ;;  %v40_v41 = vld [vmem:[#allocation2 + $0x18] sm:$0xff] }
   0xd   :  { %v48_v42 = vld [vmem:[#allocation2 + $0x50] sm:$0xff]  ;;  %v49_v47 = vld [vmem:[#allocation2 + $0x58] sm:$0xff]  ;;  %v46_v49 = vld [vmem:[#allocation2 + $0x40] sm:$0xff] }
   0xe   :  { %v47_v50 = vld [vmem:[#allocation2 + $0x48] sm:$0xff] }
  0x10   :  { %115 = vperm.xlu1 %584, %v97_v4  }
  0x11   :  { %75 = vperm.xlu0 %583, %v57_v5   ;;  %65 = vperm.xlu2 %585, %v55_v6  }
  0x18   :  { %105 = vperm.xlu1 %584, %v95_v7  }
  0x19   :  { %100 = vperm.xlu0 %583, %v94_v8  }
  0x63   :  { %v61_v14 = vpop.permute.xlu2 %60 }
  0x64   :  { %v78_v35 = vmul.f32 %v61_v14, %v37_v27  ;;  %v79_v54 = vmul.f32 %v61_v14, %v38_v34  ;;  %v80_v63 = vmul.f32 %v61_v14, %v46_v49  ;;  %v81_v0 = vmul.f32 %v61_v14, %v47_v50 }
  0x6b   :  { %v66_v39 = vpop.permute.xlu2 %65 }
  0x6c   :  { %v82_v55 = vmul.f32 %v66_v39, %v39_v40  ;;  %v83_v56 = vmul.f32 %v66_v39, %v40_v41  ;;  %v84_v57 = vmul.f32 %v66_v39, %v48_v42  ;;  %v85_v58 = vmul.f32 %v66_v39, %v49_v47 }
  0x7a   :  { %v111_v9 = vpop.permute.xlu1 %110 }
  0x7b   :  { %v71_v10 = vpop.permute.xlu0 %70 }
  0x7c   :  { %v86_v15 = vmul.f32 %v71_v10, %v41_v11  ;;  %v88_v16 = vmul.f32 %v71_v10, %v50_v12  ;;  %v89_v17 = vmul.f32 %v71_v10, %v51_v13  ;;  %v87_v23 = vmul.f32 %v71_v10, %v42_v18 }
  0x7e   :  { %v784_v24 = vadd.f32 %v111_v9, %v86_v15  ;;  %v786_v25 = vadd.f32 %v111_v9, %v88_v16  ;;  %v788_v26 = vadd.f32 %v111_v9, %v89_v17  ;;  %v127_v43 = vadd.f32 %v111_v9, %v87_v23 }
  0x80   :  { %v142_v44 = vmax.f32 %v784_v24, 0.0  ;;  %v144_v45 = vmax.f32 %v786_v25, 0.0  ;;  %v145_v48 = vmax.f32 %v788_v26, 0.0  ;;  %v143_v62 = vmax.f32 %v127_v43, 0.0 }
  0x82   :  { %v116_v28 = vpop.permute.xlu1 %115 }
  0x83   :  { %v76_v29 = vpop.permute.xlu0 %75 }
  0x84   :  { %v90_v30 = vmul.f32 %v76_v29, %v43_v19  ;;  %v91_v31 = vmul.f32 %v76_v29, %v44_v20  ;;  %v92_v32 = vmul.f32 %v76_v29, %v52_v21  ;;  %v93_v33 = vmul.f32 %v76_v29, %v53_v22 }
  0x86   :  { %v130_v36 = vadd.f32 %v116_v28, %v90_v30  ;;  %v132_v37 = vadd.f32 %v116_v28, %v92_v32  ;;  %v133_v38 = vadd.f32 %v116_v28, %v93_v33  ;;  %v131_v46 = vadd.f32 %v116_v28, %v91_v31 }
  0x87   :  { %v150_v33 = vlaneseq }
  0x88   :  { %v146_v51 = vmax.f32 %v130_v36, 0.0  ;;  %v148_v52 = vmax.f32 %v132_v37, 0.0  ;;  %v149_v53 = vmax.f32 %v133_v38, 0.0  ;;  %v147_v1 = vmax.f32 %v131_v46, 0.0 }
  0x8a   :  { %v591_v59 = vpack.i.bf16 %v149_v53, %v145_v48  ;;  %v586_v60 = vpack.i.bf16 %v148_v52, %v144_v45  ;;  %v596_v61 = vpack.i.bf16 %v146_v51, %v142_v44  ;;  %v106_v2 = vpop.permute.xlu1 %105  ;;  %v796_v20 = vpack.c.bf16 %v148_v52, %v144_v45 }
  0x8b   :  { %v101_v3 = vpop.permute.xlu0 %100  ;;  %v122_v4 = vadd.f32 %v106_v2, %v82_v55  ;;  %v123_v5 = vadd.f32 %v106_v2, %v83_v56  ;;  %v124_v6 = vadd.f32 %v106_v2, %v84_v57  ;;  %v125_v7 = vadd.f32 %v106_v2, %v85_v58 }
  0x8c   :  { %592 = vrot.lane.b32.xlu0 %v591_v59, %s722_s1  ;;  %v118_v8 = vadd.f32 %v101_v3, %v78_v35  ;;  %v119_v9 = vadd.f32 %v101_v3, %v79_v54  ;;  %v120_v10 = vadd.f32 %v101_v3, %v80_v63  ;;  %v121_v11 = vadd.f32 %v101_v3, %v81_v0 }
  0x8d   :  { %587 = vrot.lane.b32.xlu2 %v586_v60, %s722_s1  ;;  %v138_v12 = vmax.f32 %v122_v4, 0.0  ;;  %v139_v13 = vmax.f32 %v123_v5, 0.0  ;;  %v140_v15 = vmax.f32 %v124_v6, 0.0  ;;  %v141_v14 = vmax.f32 %v125_v7, 0.0  ;;  %597 = vrot.lane.b32.xlu1 %v596_v61, %s722_s1 }
  0x8e   :  { %v134_v16 = vmax.f32 %v118_v8, 0.0  ;;  %v135_v17 = vmax.f32 %v119_v9, 0.0  ;;  %v136_v18 = vmax.f32 %v120_v10, 0.0  ;;  %v137_v19 = vmax.f32 %v121_v11, 0.0 }
  0x8f   :  { %v798_v21 = vpack.c.bf16 %v149_v53, %v145_v48  ;;  %v800_v22 = vpack.c.bf16 %v146_v51, %v142_v44  ;;  %v802_v23 = vpack.c.bf16 %v147_v1, %v143_v62  ;;  %v601_v25 = vpack.i.bf16 %v147_v1, %v143_v62 }
  0x90   :  { %v606_v24 = vpack.i.bf16 %v140_v15, %v136_v18  ;;  %v804_v26 = vpack.c.bf16 %v140_v15, %v136_v18  ;;  %v806_v27 = vpack.c.bf16 %v141_v14, %v137_v19  ;;  %v808_v28 = vpack.c.bf16 %v138_v12, %v134_v16 }
  0x91   :  { %v810_v29 = vpack.c.bf16 %v139_v13, %v135_v17  ;;  %v611_v30 = vpack.i.bf16 %v141_v14, %v137_v19  ;;  %v621_v31 = vpack.i.bf16 %v139_v13, %v135_v17  ;;  %v616_v32 = vpack.i.bf16 %v138_v12, %v134_v16 }
  0x92   :  { %v817_v35 = vand.u32 127, %v150_v33 }
  0x94   :  { %607 = vrot.lane.b32.xlu0 %v606_v24, %s722_s1  ;;  %v152_v36 = vadd.s32 128, %v817_v35  ;;  %vm254_vm0 = vcmp.lt.s32.totalorder %v817_v35, 127  ;;  %vm187_vm3 = vcmp.lt.s32.totalorder %v817_v35, 1  ;;  %vm572_vm4 = vcmp.ne.s32.totalorder %v817_v35, 0  ;;  %v571_v35 = vld [vmem:[%s951_s3 + $0x8] sm:$0xff] }
  0x95   :  { %602 = vrot.lane.b32.xlu2 %v601_v25, %s722_s1  ;;  %612 = vrot.lane.b32.xlu1 %v611_v30, %s722_s1  ;;  %vm881_vm5 = vmpackc.low %vm572_vm4, %vm572_vm4 }
  0x96   :  { %vm573_vm1 = vcmp.ne.s32.totalorder %v152_v36, 255 }
  0x97   :  { %vm825_vm2 = vmpackc.low %vm573_vm1, %vm573_vm1 }
  0x9c   :  { %622 = vrot.lane.b32.xlu0 %v621_v31, %s722_s1 }
  0x9d   :  { %617 = vrot.lane.b32.xlu2 %v616_v32, %s722_s1  ;;  %627 = vrot.lane.b32.xlu1 %v601_v25, %s723_s2 }
  0xa4   :  { %637 = vrot.lane.b32.xlu0 %v591_v59, %s723_s2 }
  0xa5   :  { %632 = vrot.lane.b32.xlu2 %v586_v60, %s723_s2  ;;  %642 = vrot.lane.b32.xlu1 %v596_v61, %s723_s2 }
  0xac   :  { %652 = vrot.lane.b32.xlu0 %v606_v24, %s723_s2 }
  0xad   :  { %647 = vrot.lane.b32.xlu2 %v621_v31, %s723_s2  ;;  %657 = vrot.lane.b32.xlu1 %v611_v30, %s723_s2 }
  0xb5   :  { %662 = vrot.lane.b32.xlu2 %v616_v32, %s723_s2 }
  0xe7   :  { %v588_v34 = vpop.permute.xlu2 %587 }
  0xe8   :  { %v590_v38 = vunpack.i.h.bf16 %v588_v34  ;;  %v589_v39 = vunpack.i.l.bf16 %v588_v34 }
  0xef   :  { %v603_v37 = vpop.permute.xlu2 %602 }
  0xf0   :  { %v605_v40 = vunpack.i.h.bf16 %v603_v37  ;;  %v604_v41 = vunpack.i.l.bf16 %v603_v37 }
  0xf2   :  { %v261_v42 = vsel %vm254_vm0, %v604_v41, %v589_v39  ;;  %v262_v43 = vsel %vm254_vm0, %v605_v40, %v590_v38 }
  0xf3   :  { %v537_v45 = vpack.c.bf16 %v262_v43, %v261_v42 }
  0xf5   :  { %538 = vmatpush.bf16.msk.msra.mxu1 %vm825_vm2, %v537_v45 }
  0xf7   :  { %v618_v46 = vpop.permute.xlu2 %617 }
  0xf8   :  { %v620_v3 = vunpack.i.h.bf16 %v618_v46  ;;  %v619_v4 = vunpack.i.l.bf16 %v618_v46 }
  0xfe   :  { %v593_v47 = vpop.permute.xlu0 %592 }
  0xff   :  { %v595_v48 = vunpack.i.h.bf16 %v593_v47  ;;  %v594_v49 = vunpack.i.l.bf16 %v593_v47  ;;  %v598_v50 = vpop.permute.xlu1 %597  ;;  %v835_v56 = vpop.permute.xlu2 %632 }
 0x100   :  { %v600_v51 = vunpack.i.h.bf16 %v598_v50  ;;  %v599_v52 = vunpack.i.l.bf16 %v598_v50  ;;  %v635_v33 = vunpack.i.h.bf16 %v835_v56  ;;  %v634_v34 = vunpack.i.l.bf16 %v835_v56 }
 0x101   :  { %v257_v53 = vsel %vm254_vm0, %v589_v39, %v594_v49  ;;  %v258_v54 = vsel %vm254_vm0, %v590_v38, %v595_v48 }
 0x102   :  { %v309_v55 = vpack.c.bf16 %v258_v54, %v257_v53  ;;  %v265_v57 = vsel %vm254_vm0, %v599_v52, %v604_v41  ;;  %v266_v58 = vsel %vm254_vm0, %v600_v51, %v605_v40  ;;  %v269_v59 = vsel %vm254_vm0, %v594_v49, %v599_v52 }
 0x103   :  { %v270_v60 = vsel %vm254_vm0, %v595_v48, %v600_v51  ;;  %v307_v61 = vpack.c.bf16 %v266_v58, %v265_v57 }
 0x104   :  { %372 = vmatpush.bf16.msra.mxu2 %v309_v55  ;;  %v561_v62 = vpack.c.bf16 %v270_v60, %v269_v59 }
 0x105   :  { %334 = vmatpush.bf16.msra.mxu0 %v307_v61 }
 0x106   :  { %562 = vmatpush.bf16.msk.msra.mxu3 %vm825_vm2, %v561_v62  ;;  %v608_v63 = vpop.permute.xlu0 %607 }
 0x107   :  { %v610_v0 = vunpack.i.h.bf16 %v608_v63  ;;  %v609_v1 = vunpack.i.l.bf16 %v608_v63  ;;  %v613_v2 = vpop.permute.xlu1 %612  ;;  %v855_v13 = vpop.permute.xlu2 %647 }
 0x108   :  { %v615_v5 = vunpack.i.h.bf16 %v613_v2  ;;  %v614_v6 = vunpack.i.l.bf16 %v613_v2  ;;  %v650_v52 = vunpack.i.h.bf16 %v855_v13 }
 0x10a   :  { %v255_v7 = vsel %vm254_vm0, %v609_v1, %v614_v6  ;;  %v256_v8 = vsel %vm254_vm0, %v610_v0, %v615_v5  ;;  %v267_v9 = vsel %vm254_vm0, %v614_v6, %v619_v4  ;;  %v268_v10 = vsel %vm254_vm0, %v615_v5, %v620_v3  ;;  %v570_v5 = vld [vmem:[%s951_s3] sm:$0xff] }
 0x10b   :  { %v305_v11 = vpack.c.bf16 %v256_v8, %v255_v7  ;;  %v566_v12 = vpack.c.bf16 %v268_v10, %v267_v9 }
 0x10d   :  { %373 = vmatpush.bf16.msra.mxu2 %v305_v11  ;;  %567 = vmatpush.bf16.msk.msra.mxu3 %vm825_vm2, %v566_v12 }
 0x10e   :  { %v623_v15 = vpop.permute.xlu0 %622 }
 0x10f   :  { %v625_v14 = vunpack.i.h.bf16 %v623_v15  ;;  %v624_v16 = vunpack.i.l.bf16 %v623_v15  ;;  %v628_v17 = vpop.permute.xlu1 %627  ;;  %v663_v38 = vpop.permute.xlu2 %662 }
 0x110   :  { %v630_v18 = vunpack.i.h.bf16 %v628_v17  ;;  %v629_v19 = vunpack.i.l.bf16 %v628_v17  ;;  %v664_v46 = vunpack.i.l.bf16 %v663_v38  ;;  %v665_v48 = vunpack.i.h.bf16 %v663_v38 }
 0x111   :  { %v263_v24 = vsel %vm254_vm0, %v619_v4, %v624_v16  ;;  %v264_v25 = vsel %vm254_vm0, %v620_v3, %v625_v14  ;;  %374 = vmatpush.bf16.msra.mxu2 %v796_v20  ;;  %393 = vmatpush.bf16.msra.mxu3 %v798_v21  ;;  %v259_v31 = vsel %vm254_vm0, %v624_v16, %v609_v1 }
 0x112   :  { %v303_v30 = vpack.c.bf16 %v264_v25, %v263_v24  ;;  %v260_v32 = vsel %vm254_vm0, %v625_v14, %v610_v0  ;;  %v194_v20 = vsel %vm187_vm3, %v629_v19, %v634_v34  ;;  %v195_v21 = vsel %vm187_vm3, %v630_v18, %v635_v33 }
 0x113   :  { %v542_v36 = vpack.c.bf16 %v260_v32, %v259_v31  ;;  %v549_v43 = vpack.c.bf16 %v195_v21, %v194_v20 }
 0x114   :  { %335 = vmatpush.bf16.msra.mxu0 %v303_v30 }
 0x115   :  { %543 = vmatpush.bf16.msk.msra.mxu1 %vm825_vm2, %v542_v36  ;;  %375 = vmatpush.bf16.msra.mxu2 %v804_v26 }
 0x116   :  { %394 = vmatpush.bf16.msra.mxu3 %v806_v27  ;;  %v638_v37 = vpop.permute.xlu0 %637 }
 0x117   :  { %v640_v39 = vunpack.i.h.bf16 %v638_v37  ;;  %v639_v40 = vunpack.i.l.bf16 %v638_v37  ;;  %v643_v42 = vpop.permute.xlu1 %642 }
 0x118   :  { %336 = vmatpush.bf16.msra.mxu0 %v800_v22  ;;  %v645_v44 = vunpack.i.h.bf16 %v643_v42  ;;  %v644_v45 = vunpack.i.l.bf16 %v643_v42 }
 0x119   :  { %355 = vmatpush.bf16.msra.mxu1 %v802_v23  ;;  %v190_v26 = vsel %vm187_vm3, %v634_v34, %v639_v40  ;;  %v191_v27 = vsel %vm187_vm3, %v635_v33, %v640_v39  ;;  %550 = vmatpush.bf16.msk.msra.mxu2 %vm881_vm5, %v549_v43  ;;  %v649_v23 = vunpack.i.l.bf16 %v855_v13 }
 0x11a   :  { %v294_v47 = vpack.c.bf16 %v191_v27, %v190_v26  ;;  %v202_v22 = vsel %vm187_vm3, %v639_v40, %v644_v45  ;;  %v203_v49 = vsel %vm187_vm3, %v640_v39, %v645_v44  ;;  %v198_v50 = vsel %vm187_vm3, %v644_v45, %v629_v19 }
 0x11b   :  { %v199_v51 = vsel %vm187_vm3, %v645_v44, %v630_v18  ;;  %v525_v54 = vpack.c.bf16 %v203_v49, %v202_v22  ;;  %v196_v55 = vsel %vm187_vm3, %v664_v46, %v649_v23 }
 0x11c   :  { %337 = vmatpush.bf16.msra.mxu0 %v808_v28  ;;  %395 = vmatpush.bf16.msra.mxu3 %v294_v47  ;;  %v292_v58 = vpack.c.bf16 %v199_v51, %v198_v50  ;;  %v197_v28 = vsel %vm187_vm3, %v665_v48, %v650_v52 }
 0x11d   :  { %356 = vmatpush.bf16.msra.mxu1 %v810_v29  ;;  %v288_v63 = vpack.c.bf16 %v197_v28, %v196_v55 }
 0x11e   :  { %v653_v53 = vpop.permute.xlu0 %652 }
 0x11f   :  { %v655_v56 = vunpack.i.h.bf16 %v653_v53  ;;  %v654_v57 = vunpack.i.l.bf16 %v653_v53  ;;  %v658_v59 = vpop.permute.xlu1 %657 }
 0x120   :  { %526 = vmatpush.bf16.msk.msra.mxu0 %vm881_vm5, %v525_v54  ;;  %v660_v60 = vunpack.i.h.bf16 %v658_v59  ;;  %v659_v61 = vunpack.i.l.bf16 %v658_v59 }
 0x121   :  { %357 = vmatpush.bf16.msra.mxu1 %v292_v58  ;;  %v192_v29 = vsel %vm187_vm3, %v649_v23, %v654_v57  ;;  %v193_v62 = vsel %vm187_vm3, %v650_v52, %v655_v56 }
 0x122   :  { %v554_v0 = vpack.c.bf16 %v193_v62, %v192_v29  ;;  %v200_v1 = vsel %vm187_vm3, %v659_v61, %v664_v46  ;;  %v201_v2 = vsel %vm187_vm3, %v660_v60, %v665_v48  ;;  %v188_v3 = vsel %vm187_vm3, %v654_v57, %v659_v61 }
 0x123   :  { %v189_v4 = vsel %vm187_vm3, %v655_v56, %v660_v60  ;;  %v530_v6 = vpack.c.bf16 %v201_v2, %v200_v1 }
 0x124   :  { %555 = vmatpush.bf16.msk.msra.mxu2 %vm881_vm5, %v554_v0  ;;  %v290_v7 = vpack.c.bf16 %v189_v4, %v188_v3 }
 0x125   :  { %358 = vmatpush.bf16.msra.mxu1 %v288_v63  ;;  %531 = vmatpush.bf16.msk.msra.mxu0 %vm881_vm5, %v530_v6 }
 0x126   :  { %396 = vmatpush.bf16.msra.mxu3 %v290_v7 }
 0x127   :  { %556 = vmatmul.msk.bf16.vlgmr.msra.gmra.mxu2 %vm325_vm6, %v570_v5 }
 0x128   :  { %544 = vmatmul.msk.bf16.vlgmr.msra.gmra.mxu1 %vm325_vm6, %v570_v5  ;;  %532 = vmatmul.msk.bf16.vlgmr.msra.gmra.mxu0 %vm325_vm6, %v570_v5 }
 0x129   :  { %568 = vmatmul.msk.bf16.vlgmr.msra.gmra.mxu3 %vm325_vm6, %v570_v5 }
 0x137   :  { %557 = vmatmul.msk.bf16.gmra.mxu2 %vm325_vm6, %v571_v35 }
 0x138   :  { %545 = vmatmul.msk.bf16.gmra.mxu1 %vm325_vm6, %v571_v35  ;;  %533 = vmatmul.msk.bf16.gmra.mxu0 %vm325_vm6, %v571_v35 }
 0x139   :  { %569 = vmatmul.msk.bf16.gmra.mxu3 %vm325_vm6, %v571_v35 }
 0x1a5   :  { %v360_v8 = vpop.f32.mrf.mxu1  ;;  %v341_v9 = vpop.f32.mrf.mxu0 }
 0x1a6   :  { %v408_v10 = vadd.f32 %v360_v8, %v341_v9  ;;  %v474_v11 = vpack.c.bf16 %v360_v8, %v341_v9  ;;  %v428_v12 = vmul.f32 %v341_v9, %v341_v9  ;;  %v429_v13 = vmul.f32 %v360_v8, %v360_v8 }
 0x1a8   :  { %478 = vst [vmem:[#allocation5] sm:$0xff] %v474_v11  ;;  %v444_v25 = vadd.f32 %v429_v13, %v428_v12 }
 0x1aa   :  { %v379_v15 = vpop.f32.mrf.mxu2 }
 0x1ab   :  { %v409_v14 = vadd.f32 %v408_v10, %v379_v15  ;;  %v430_v17 = vmul.f32 %v379_v15, %v379_v15 }
 0x1ac   :  { %v398_v16 = vpop.f32.mrf.mxu3 }
 0x1ad   :  { %v482_v18 = vpack.c.bf16 %v398_v16, %v379_v15  ;;  %v362_v19 = vpop.f32.mrf.mxu1  ;;  %v410_v24 = vadd.f32 %v409_v14, %v398_v16  ;;  %v343_v30 = vpop.f32.mrf.mxu0  ;;  %v431_v33 = vmul.f32 %v398_v16, %v398_v16  ;;  %v445_v34 = vadd.f32 %v444_v25, %v430_v17 }
 0x1ae   :  { %v475_v31 = vpack.c.bf16 %v362_v19, %v343_v30  ;;  %v413_v32 = vadd.f32 %v362_v19, %v343_v30  ;;  %v432_v20 = vmul.f32 %v343_v30, %v343_v30  ;;  %v433_v21 = vmul.f32 %v362_v19, %v362_v19 }
 0x1af   :  { %487 = vst [vmem:[#allocation5 + $0x20] sm:$0xff] %v482_v18  ;;  %411 = vadd.xlane.f32.xlu0 %v410_v24  ;;  %v446_v42 = vadd.f32 %v445_v34, %v431_v33 }
 0x1b0   :  { %479 = vst [vmem:[#allocation5 + $0x8] sm:$0xff] %v475_v31  ;;  %v449_v27 = vadd.f32 %v433_v21, %v432_v20 }
 0x1b2   :  { %v381_v36 = vpop.f32.mrf.mxu2 }
 0x1b3   :  { %v414_v37 = vadd.f32 %v413_v32, %v381_v36  ;;  %v434_v39 = vmul.f32 %v381_v36, %v381_v36 }
 0x1b4   :  { %v400_v38 = vpop.f32.mrf.mxu3 }
 0x1b5   :  { %v483_v40 = vpack.c.bf16 %v400_v38, %v381_v36  ;;  %v365_v41 = vpop.f32.mrf.mxu1  ;;  %v415_v43 = vadd.f32 %v414_v37, %v400_v38  ;;  %v346_v44 = vpop.f32.mrf.mxu0  ;;  %v450_v46 = vadd.f32 %v449_v27, %v434_v39  ;;  %v435_v48 = vmul.f32 %v400_v38, %v400_v38 }
 0x1b6   :  { %v418_v45 = vadd.f32 %v365_v41, %v346_v44  ;;  %v476_v26 = vpack.c.bf16 %v365_v41, %v346_v44  ;;  %v436_v57 = vmul.f32 %v346_v44, %v346_v44  ;;  %v437_v58 = vmul.f32 %v365_v41, %v365_v41 }
 0x1b7   :  { %488 = vst [vmem:[#allocation5 + $0x28] sm:$0xff] %v483_v40  ;;  %447 = vadd.xlane.f32.xlu0 %v446_v42  ;;  %416 = vadd.xlane.f32.xlu1 %v415_v43  ;;  %v451_v51 = vadd.f32 %v450_v46, %v435_v48 }
 0x1b8   :  { %480 = vst [vmem:[#allocation5 + $0x10] sm:$0xff] %v476_v26  ;;  %v454_v0 = vadd.f32 %v437_v58, %v436_v57 }
 0x1ba   :  { %v384_v47 = vpop.f32.mrf.mxu2 }
 0x1bb   :  { %v419_v22 = vadd.f32 %v418_v45, %v384_v47  ;;  %v438_v62 = vmul.f32 %v384_v47, %v384_v47 }
 0x1bc   :  { %v403_v49 = vpop.f32.mrf.mxu3 }
 0x1bd   :  { %v484_v23 = vpack.c.bf16 %v403_v49, %v384_v47  ;;  %v367_v50 = vpop.f32.mrf.mxu1  ;;  %v420_v52 = vadd.f32 %v419_v22, %v403_v49  ;;  %v348_v53 = vpop.f32.mrf.mxu0  ;;  %v439_v6 = vmul.f32 %v403_v49, %v403_v49  ;;  %v455_v7 = vadd.f32 %v454_v0, %v438_v62 }
 0x1be   :  { %v440_v54 = vmul.f32 %v348_v53, %v348_v53  ;;  %v441_v55 = vmul.f32 %v367_v50, %v367_v50  ;;  %v477_v56 = vpack.c.bf16 %v367_v50, %v348_v53  ;;  %v423_v28 = vadd.f32 %v367_v50, %v348_v53 }
 0x1bf   :  { %489 = vst [vmem:[#allocation5 + $0x30] sm:$0xff] %v484_v23  ;;  %452 = vadd.xlane.f32.xlu1 %v451_v51  ;;  %421 = vadd.xlane.f32.xlu2 %v420_v52  ;;  %v456_v35 = vadd.f32 %v455_v7, %v439_v6 }
 0x1c0   :  { %481 = vst [vmem:[#allocation5 + $0x18] sm:$0xff] %v477_v56  ;;  %v459_v60 = vadd.f32 %v441_v55, %v440_v54 }
 0x1c2   :  { %v386_v59 = vpop.f32.mrf.mxu2 }
 0x1c3   :  { %v424_v61 = vadd.f32 %v423_v28, %v386_v59  ;;  %v442_v29 = vmul.f32 %v386_v59, %v386_v59 }
 0x1c4   :  { %v405_v63 = vpop.f32.mrf.mxu3 }
 0x1c5   :  { %v443_v1 = vmul.f32 %v405_v63, %v405_v63  ;;  %v485_v2 = vpack.c.bf16 %v405_v63, %v386_v59  ;;  %v425_v3 = vadd.f32 %v424_v61, %v405_v63  ;;  %v460_v4 = vadd.f32 %v459_v60, %v442_v29 }
 0x1c7   :  { %490 = vst [vmem:[#allocation5 + $0x38] sm:$0xff] %v485_v2  ;;  %426 = vadd.xlane.f32.xlu2 %v425_v3  ;;  %v461_v5 = vadd.f32 %v460_v4, %v443_v1 }
 0x1c8   :  { %503 = dma.vmem_to_hbm [thread:$0]  %s496_s22, 1024, %s498_s20, [#allocation4], %s725_s23, %s725_s23, %s726_s24  }
 0x1c9   :  { %462 = vadd.xlane.f32.xlu0 %v461_v5 }
 0x1cf   :  { %457 = vadd.xlane.f32.xlu2 %v456_v35 }
 0x222   :  { %v412_v8 = vpop.xlane.xlu0 %411 }
 0x22a   :  { %v448_v9 = vpop.xlane.xlu0 %447  ;;  %v417_v10 = vpop.xlane.xlu1 %416 }
 0x22b   :  { %v465_v11 = vsel %vm464_vm7, %v412_v8, %v448_v9 }
 0x22c   :  { %470 = vst.msk [vmem:[%s953_s5] sm:$0xff] %vm469_vm8, %v465_v11 }
 0x232   :  { %v453_v12 = vpop.xlane.xlu1 %452  ;;  %v422_v13 = vpop.xlane.xlu2 %421 }
 0x233   :  { %v466_v15 = vsel %vm464_vm7, %v417_v10, %v453_v12 }
 0x234   :  { %471 = vst.msk [vmem:[%s953_s5 + $0x8] sm:$0xff] %vm469_vm8, %v466_v15 }
 0x23a   :  { %v427_v14 = vpop.xlane.xlu2 %426 }
 0x23c   :  { %v463_v16 = vpop.xlane.xlu0 %462 }
 0x23d   :  { %v468_v17 = vsel %vm464_vm7, %v427_v14, %v463_v16 }
 0x23e   :  { %473 = vst.msk [vmem:[%s953_s5 + $0x18] sm:$0xff] %vm469_vm8, %v468_v17 }
 0x242   :  { %v458_v18 = vpop.xlane.xlu2 %457 }
 0x243   :  { %v467_v19 = vsel %vm464_vm7, %v422_v13, %v458_v18 }
 0x244   :  { %472 = vst.msk [vmem:[%s953_s5 + $0x10] sm:$0xff] %vm469_vm8, %v467_v19 }
 0x245   :  { %716 = dma.done.wait [#allocation4], 1024  }
 0x246   :  { %717 = vsyncadd [#allocation4], 4294966272 }
 0x247   :  { %512 = vsyncpa [#allocation3], 1 }
 0x248   :  { %513 = vsyncpa [#allocation4], 1 }

</bundles_post_ra>
